<compile_context>
chip_gen: v7x
topology: tpu7x:2x2x1
jax: 0.10.0
libtpu: 0.0.40
codegen_flags: <defaults>
</compile_context>

<pallas_src>
import math
import functools

import jax
import jax.numpy as jnp
from jax.experimental import pallas as pl
from jax.experimental.pallas import tpu as pltpu


# ----------------------------------------------------------------------------
# Pallas kernel: fused "x + pe" on sublane/lane-dense tiles
# ----------------------------------------------------------------------------
def _pe_add_kernel(x_ref, pe_ref, o_ref):
    # x_ref / o_ref : (1, tb, LN) tile of one batch element's activations
    # pe_ref        : (1, tb, LN) matching tile of the positional-encoding table
    o_ref[...] = x_ref[...] + pe_ref[...]


def _pick_rows_per_block(n_rows, row_bytes, block_bytes):
    """Largest sublane-friendly row count whose block stays under block_bytes."""
    max_rows = max(1, block_bytes // row_bytes)
    if n_rows <= max_rows:
        return n_rows                       # full extent: always a legal block dim
    return max(8, (max_rows // 8) * 8)      # multiple of 8 => sublane-dense tiles


def positional_encoding_forward(x, pe, *, block_bytes=1 << 20,
                                min_pallas_bytes=1 << 20):
    """forward(x) = dropout(x + pe[:T]) with dropout == identity.

    x : (B, T, D) activations; pe : (max_len, D) positional-encoding buffer.
    """
    B, T, D = x.shape
    # Stream pe in the activation dtype (avoids a mixed-dtype add and halves
    # the pe read for bf16 models).
    pe_t = jax.lax.slice(pe, (0, 0), (T, D)).astype(x.dtype)

    itemsize = jnp.dtype(x.dtype).itemsize
    if x.size * itemsize < min_pallas_bytes:
        # Tiny activations: pallas_call launch + per-step overhead dominates;
        # XLA's fused broadcast-add is at parity or faster.
        return x + pe_t[None, :, :]

    N = T * D
    if N % 128 == 0:
        # Lane-dense layout: fold (T, D) -> (rows, LN), LN a multiple of 128,
        # so stores are full-width vst and vregs are fully occupied.  The
        # reshape is pure layout plumbing on contiguous data (bitcast).
        if N % 512 == 0:
            LN = 512
        elif N % 256 == 0:
            LN = 256
        else:
            LN = 128
        rows = N // LN
        x_k = x.reshape(B, rows, LN)
        pe_k = pe_t.reshape(1, rows, LN)
    else:
        # Unaligned d_model fallback: keep (B, T, D); last dim is full-extent
        # (always legal), rows tiled in multiples of 8 so the working set is
        # bounded even for long sequences (v7x: 64 MiB physical VMEM).
        LN = D
        rows = T
        x_k = x
        pe_k = pe_t.reshape(1, T, D)

    tb = _pick_rows_per_block(rows, LN * itemsize, block_bytes)
    num_j = pl.cdiv(rows, tb)          # partial tail block is masked by Pallas
    per_block = tb * LN * itemsize

    # Grid order: row/token axis OUTER ("parallel": carries the work, shardable
    # across v7x's two TensorCores), batch INNER ("arbitrary": consecutive grid
    # steps keep the same pe block index, so pe is DMA'd once per row-block,
    # not once per (row-block, batch) pair).
    grid = (num_j, B)

    out_k = pl.pallas_call(
        _pe_add_kernel,
        out_shape=jax.ShapeDtypeStruct(x_k.shape, x.dtype),
        grid=grid,
        in_specs=[
            pl.BlockSpec((1, tb, LN), lambda j, b: (b, j, 0)),
            pl.BlockSpec((1, tb, LN), lambda j, b: (0, j, 0)),  # batch-invariant
        ],
        out_specs=pl.BlockSpec((1, tb, LN), lambda j, b: (b, j, 0)),
        compiler_params=pltpu.CompilerParams(
            dimension_semantics=("parallel", "arbitrary"),
            # 2 pipeline buffers x 3 operands x block + headroom; explicit so
            # raising block_bytes never trips the per-generation default
            # scoped limits (16 MiB v5e, 32 MiB v6e/v7x).
            vmem_limit_bytes=int(min(32 << 20,
                                     max(8 << 20, 6 * per_block + (4 << 20)))),
        ),
        cost_estimate=pl.CostEstimate(
            flops=x.size,
            transcendentals=0,
            bytes_accessed=2 * x.size * itemsize + pe_t.size * itemsize,
        ),
    )(x_k, pe_k)
    return out_k.reshape(B, T, D)


# ----------------------------------------------------------------------------
# Module "init": build the positional-encoding buffer exactly like PyTorch
# ----------------------------------------------------------------------------
def make_positional_encoding(max_len, d_model, dtype=jnp.float32):
    position = jnp.arange(max_len, dtype=jnp.float32)[:, None]          # (L, 1)
    div_term = jnp.exp(
        jnp.arange(0, d_model, 2, dtype=jnp.float32)
        * -(math.log(10000.0) / d_model))                               # (D/2,)
    pe = jnp.zeros((max_len, d_model), jnp.float32)
    pe = pe.at[:, 0::2].set(jnp.sin(position * div_term))
    pe = pe.at[:, 1::2].set(jnp.cos(position * div_term))
    return pe.astype(dtype)


# ----------------------------------------------------------------------------
# Pure-JAX reference (correctness check)
# ----------------------------------------------------------------------------
def _ref_forward(x, pe):
    return x + pe[: x.shape[1]][None, :, :]


# ----------------------------------------------------------------------------
if __name__ == "__main__":
    B, T, D_MODEL, MAX_LEN = 2, 8, 32, 5000

    key = jax.random.PRNGKey(0)
    x = jax.random.normal(key, (B, T, D_MODEL), jnp.float32)

    pe = make_positional_encoding(MAX_LEN, D_MODEL)      # register_buffer

    # min_pallas_bytes=0 forces the Pallas path even at this toy size (the
    # default hands such tiny activations to XLA's fused broadcast-add).
    fwd = jax.jit(functools.partial(positional_encoding_forward, pe=pe,
                                    min_pallas_bytes=0))
    out = jax.block_until_ready(fwd(x))

    ref = _ref_forward(x, pe)
    assert out.shape == (B, T, D_MODEL)
    assert jnp.allclose(out, ref, atol=1e-6, rtol=1e-6), \
        f"max abs diff {jnp.max(jnp.abs(out - ref))}"

    print("KERNEL_OK")
</pallas_src>

<mosaic_0001>
module attributes {stable_mosaic.version = 11 : i64} {
  func.func @_pe_add_kernel(%arg0: i32, %arg1: i32, %arg2: memref<1x1x256xf32, #tpu.memory_space<vmem>>, %arg3: memref<1x1x256xf32, #tpu.memory_space<vmem>>, %arg4: memref<1x1x256xf32, #tpu.memory_space<vmem>>) attributes {dimension_semantics = [#tpu.dimension_semantics<parallel>, #tpu.dimension_semantics<arbitrary>], iteration_bounds = array<i64: 1, 2>, scalar_prefetch = 0 : i64, scratch_operands = 0 : i64, tpu.core_type = #tpu.core_type<tc>, window_params = [{transform_indices = @transform_0, window_bounds = array<i64: 1, 1, 256>}, {transform_indices = @transform_1, window_bounds = array<i64: 1, 1, 256>}, {transform_indices = @transform_2, window_bounds = array<i64: 1, 1, 256>}]} {
    %c0 = arith.constant 0 : index
    %c0_0 = arith.constant 0 : index
    %c0_1 = arith.constant 0 : index
    %0 = vector.load %arg2[%c0, %c0_0, %c0_1] : memref<1x1x256xf32, #tpu.memory_space<vmem>>, vector<1x1x256xf32>
    %c0_2 = arith.constant 0 : index
    %c0_3 = arith.constant 0 : index
    %c0_4 = arith.constant 0 : index
    %1 = vector.load %arg3[%c0_2, %c0_3, %c0_4] : memref<1x1x256xf32, #tpu.memory_space<vmem>>, vector<1x1x256xf32>
    %2 = arith.addf %0, %1 : vector<1x1x256xf32>
    %c0_5 = arith.constant 0 : index
    %c0_6 = arith.constant 0 : index
    %c0_7 = arith.constant 0 : index
    %3 = vector.load %arg4[%c0_5, %c0_6, %c0_7] : memref<1x1x256xf32, #tpu.memory_space<vmem>>, vector<1x1x256xf32>
    tpu.vector_store %arg4[%c0_5, %c0_6, %c0_7], %2 {strides = array<i32>} : memref<1x1x256xf32, #tpu.memory_space<vmem>>, vector<1x1x256xf32>,
    return
  }
  func.func @transform_0(%arg0: i32, %arg1: i32) -> (i32, i32, i32) {
    %c0_i32 = arith.constant 0 : i32
    %c0_i32_0 = arith.constant 0 : i32
    return %arg1, %arg0, %c0_i32 : i32, i32, i32
  }
  func.func @transform_1(%arg0: i32, %arg1: i32) -> (i32, i32, i32) {
    %c0_i32 = arith.constant 0 : i32
    %c0_i32_0 = arith.constant 0 : i32
    %c0_i32_1 = arith.constant 0 : i32
    return %c0_i32, %arg0, %c0_i32_0 : i32, i32, i32
  }
  func.func @transform_2(%arg0: i32, %arg1: i32) -> (i32, i32, i32) {
    %c0_i32 = arith.constant 0 : i32
    %c0_i32_0 = arith.constant 0 : i32
    return %arg1, %arg0, %c0_i32 : i32, i32, i32
  }
}

</mosaic_0001>

<bundles_post_ra>
// kernel: positional_encoding_forward.1
= control target key start
LH: loop header
LB: loop body
LE: loop exit
PB: predicated region body
PF: predicated region fallthrough
CT: control target
= control target key end

     0   :  { %s372_s9 = smov 0   ;;  %s374_s10 = smov 0   ;;  %s396_s0 = inlined_call_operand.vmem [shape: f32[2,1,256], index: 0, kind: input, shape index: {}]   ;;  %s397_s1 = inlined_call_operand.vmem [shape: f32[1,1,256], index: 1, kind: input, shape index: {}]   ;;  %s398_s2 = inlined_call_operand.vmem [shape: f32[2,1,256], index: 2, kind: output, shape index: {}]  }
   0x1   :  { %s376_s11 = smov 0  }
   0x2 LB: > { %s21_s12 = sadd.s32 1, %s351_s10  ;;  %p304_p0 = scmp.ge.s32.totalorder %s355_s11, 1  ;;  %s355_s11 = sphi %s376_s11, %s12_s11   ;;  %s351_s10 = sphi %s374_s10, %s400_s10   ;;  %s347_s9 = sphi %s372_s9, %s399_s9  }
   0x3   : > { %p22_p1 = scmp.ge.s32.totalorder %s21_s12, 2  ;;  %p140_p2 = scmp.lt.s32.totalorder %s355_s11, 3 }
   0x5   : > { %s402_s12 = smov (%p22_p1, %s21_s12), 0  ;;  %p141_p3 = pnand %p304_p0, %p140_p2 }
   0x6   : > { %p172_p4 = scmp.lt.s32.totalorder (!%p141_p3), %s347_s9, 1  ;;  %v195_v0 = vlaneseq (!%p141_p3)  ;;  %v193_v1 = vld [vmem:[%s397_s1] sm:$0x3] (!%p141_p3) }
   0x7   : > { %144 = sbr.rel (%p141_p3) target bundleno = 21 (0x15), region = 28 }
   0x8   : > { %vm197_vm0 = vcmp.lt.s32.totalorder (!%p141_p3), %v195_v0, 256 }
   0xe   : > { %s404_s9 = smov (!%p172_p4, %s347_s9), 1 }
   0xf   : > { %s305_s13 = sshll.u32 %s404_s9, 1 }
  0x10   : > { %s179_s18 = scalar_lea.vmem %s396_s0, %s305_s13  ;;  %s191_s21 = scalar_lea.vmem %s398_s2, %s305_s13 }
  0x11   : > { %v192_v2 = vld [vmem:[%s179_s18] sm:$0x3] }
  0x12   : > { %v194_v3 = vadd.f32 %v193_v1, %v192_v2 }
  0x14   : > { %199 = vst.msk [vmem:[%s191_s21] sm:$0x3] %vm197_vm0, %v194_v3 }
  0x15 PF: > { %s12_s11 = sadd.s32 1, %s355_s11   ;;  %s399_s9 = smov %s351_s10 }
  0x16   : > { %p9_p5 = scmp.ge.s32.totalorder %s12_s11, 4   ;;  %s400_s10 = smov %s402_s12 }
  0x18   :  { %11 = sbr.rel (!%p9_p5) target bundleno = 2 (0x2), region = 61 }

</bundles_post_ra>
